<compile_context>
chip_gen: v7x
topology: tpu7x:2x2x1
jax: 0.10.0
libtpu: 0.0.40
codegen_flags: <defaults>
</compile_context>

<pallas_src>
import jax
import jax.numpy as jnp
from jax.experimental import pallas as pl
from jax.experimental.pallas import tpu as pltpu


_MAX_TILE_ROWS = 256        # sublane cap per block
_MAX_TILE_LANES = 2048      # lane cap per block (multiple of 128)
_TARGET_BLOCK_BYTES = 3 << 20   # ~3 MiB per (3, tile_h, tile_w) f32 block


def _round_up(x: int, m: int) -> int:
    return (x + m - 1) // m * m


def _eup_recip(x):
    """Approximate reciprocal on the EUP + one Newton step (rel err ~ eps^2).

    Keeps the divide off the VALU slot (binding on v7x); EUP is otherwise idle.
    """
    r0 = pl.reciprocal(x, approx=True)
    return r0 * (2.0 - x * r0)


def _rgb2hsv_kernel(x_ref, o_ref):
    # x_ref, o_ref: (3, tile_h, tile_w) float32 in VMEM.
    r = x_ref[0]
    g = x_ref[1]
    b = x_ref[2]

    v = jnp.maximum(jnp.maximum(r, g), b)
    mn = jnp.minimum(jnp.minimum(r, g), b)
    diff = v - mn

    # Guarded denominators (masked out below where invalid).  Garbage in
    # partial edge blocks may produce NaN/Inf here; those lanes are masked
    # on the HBM write-back, so it is harmless.
    safe_diff = jnp.where(diff == 0.0, 1.0, diff)
    safe_v = jnp.where(v == 0.0, 1.0, v)

    s = jnp.where(v == 0.0, 0.0, diff * _eup_recip(safe_v))

    # cv2 tie-break order: V==R first, then V==G, else V==B.
    is_r = v == r
    is_g = jnp.logical_and(jnp.logical_not(is_r), v == g)
    num = jnp.where(is_r, g - b, jnp.where(is_g, b - r, r - g))
    # Fold the negative-hue wrap into the offset: only the V==R branch
    # (num = g - b < 0 when g < b) can produce a negative hue.
    off = jnp.where(is_r,
                    jnp.where(g < b, 360.0, 0.0),
                    jnp.where(is_g, 120.0, 240.0))
    h = off + 60.0 * (num * _eup_recip(safe_diff))
    h = jnp.where(diff == 0.0, 0.0, h)

    o_ref[0] = h
    o_ref[1] = s
    o_ref[2] = v


def _choose_tile_w(W: int) -> int:
    """Lane-block width.

    W % 128 == 0 -> fully unmasked lane-dense blocks (capped for VMEM).
    Otherwise take the whole width as one block (block dim == array dim is
    always legal); only the final 128-lane group's store is masked and there
    are NO pad/slice copies anywhere.
    """
    if W % 128 == 0:
        return min(W, _MAX_TILE_LANES)
    return W


def _choose_tile_h(H: int, tile_w: int) -> int:
    """Row-block height: big blocks, >= 8 grid steps when the image allows."""
    if H <= 8:
        return H  # single block equal to the full dim (no 8-divisibility needed)
    # VMEM cap: keep each (3, tile_h, tile_w) f32 block around 3 MiB
    # (~12 MiB with in/out double buffering -> fits v5e/v6e/v7x).
    cap = max(8, min(_MAX_TILE_ROWS,
                     (_TARGET_BLOCK_BYTES // (12 * tile_w)) // 8 * 8))
    # Aim for >= 8 row-blocks so the "parallel" grid splits evenly across
    # v7x's two TensorCores (no effect on single-TC v5e/v6e).
    want = max(8, _round_up(pl.cdiv(H, 8), 8))
    return min(cap, want)


def rgb_to_hsv_planar(x_chw: jax.Array) -> jax.Array:
    """Planar RGB (3, H, W) float32 -> planar HSV (3, H, W) float32 (fast path).

    Copy-free: the image is tiled in place — no flatten, pad, or post-slice.
    """
    C, H, W = x_chw.shape
    assert C == 3, "expected planar RGB image (3, H, W)"

    x = x_chw.astype(jnp.float32)
    tile_w = _choose_tile_w(W)
    tile_h = _choose_tile_h(H, tile_w)
    grid = (pl.cdiv(H, tile_h), pl.cdiv(W, tile_w))

    return pl.pallas_call(
        _rgb2hsv_kernel,
        out_shape=jax.ShapeDtypeStruct((3, H, W), jnp.float32),
        grid_spec=pltpu.PrefetchScalarGridSpec(
            num_scalar_prefetch=0,
            grid=grid,
            in_specs=[pl.BlockSpec((3, tile_h, tile_w), lambda i, j: (0, i, j))],
            out_specs=pl.BlockSpec((3, tile_h, tile_w), lambda i, j: (0, i, j)),
        ),
        compiler_params=pltpu.CompilerParams(
            dimension_semantics=("parallel", "parallel"),
            vmem_limit_bytes=32 * 1024 * 1024,  # covers v5e's 16 MiB scoped default
        ),
    )(x)


def hsv_image(img_hwc: jax.Array) -> jax.Array:
    """RGB (H, W, 3) float32 -> HSV (H, W, 3) float32, cv2 float semantics.

    Note: the HWC<->CHW transposes here are extra HBM passes (~24 B/px each);
    pipelines that already hold planar CHW data should call rgb_to_hsv_planar
    directly, and CHW-consuming callers should skip the output transpose.
    """
    H, W, C = img_hwc.shape
    assert C == 3, "expected RGB image (H, W, 3)"
    x_chw = jnp.transpose(img_hwc, (2, 0, 1)).astype(jnp.float32)
    out_chw = rgb_to_hsv_planar(x_chw)
    return jnp.transpose(out_chw, (1, 2, 0))


def _hsv_reference(img_hwc):
    """Pure-JAX reference of cv2 float32 RGB->HSV for a sanity check."""
    r, g, b = img_hwc[..., 0], img_hwc[..., 1], img_hwc[..., 2]
    v = jnp.maximum(jnp.maximum(r, g), b)
    mn = jnp.minimum(jnp.minimum(r, g), b)
    diff = v - mn
    sd = jnp.where(diff == 0.0, 1.0, diff)
    sv = jnp.where(v == 0.0, 1.0, v)
    s = jnp.where(v == 0.0, 0.0, diff / sv)
    h = jnp.where(
        v == r,
        60.0 * (g - b) / sd,
        jnp.where(v == g, 120.0 + 60.0 * (b - r) / sd,
                  240.0 + 60.0 * (r - g) / sd),
    )
    h = jnp.where(diff == 0.0, 0.0, h)
    h = jnp.where(h < 0.0, h + 360.0, h)
    return jnp.stack([h, s, v], axis=-1)


if __name__ == "__main__":
    key = jax.random.PRNGKey(0)

    # Case 1: lane-aligned width (W % 128 == 0) -> fully unmasked stores.
    H1, W1 = 16, 128
    img1 = jax.random.uniform(key, (H1, W1, 3), dtype=jnp.float32)
    # Exercise the v==0, diff==0 and negative-hue-wrap branches explicitly.
    img1 = img1.at[0, 0].set(jnp.array([0.0, 0.0, 0.0], jnp.float32))
    img1 = img1.at[0, 1].set(jnp.array([0.5, 0.5, 0.5], jnp.float32))
    img1 = img1.at[0, 2].set(jnp.array([0.8, 0.1, 0.4], jnp.float32))
    out1 = hsv_image(img1)
    jax.block_until_ready(out1)
    ref1 = _hsv_reference(img1)
    assert out1.shape == (H1, W1, 3)
    assert jnp.allclose(out1, ref1, atol=1e-3, rtol=1e-4), \
        float(jnp.max(jnp.abs(out1 - ref1)))

    # Case 2: ragged shape (17 x 23) -> partial row/lane blocks, still copy-free.
    H2, W2 = 17, 23
    img2 = jax.random.uniform(jax.random.PRNGKey(1), (H2, W2, 3), dtype=jnp.float32)
    out2 = hsv_image(img2)
    jax.block_until_ready(out2)
    ref2 = _hsv_reference(img2)
    assert out2.shape == (H2, W2, 3)
    assert jnp.allclose(out2, ref2, atol=1e-3, rtol=1e-4), \
        float(jnp.max(jnp.abs(out2 - ref2)))

    # Case 3: planar fast path directly (the recommended entry point).
    x_chw = jnp.transpose(img1, (2, 0, 1))
    out3 = rgb_to_hsv_planar(x_chw)
    jax.block_until_ready(out3)
    assert out3.shape == (3, H1, W1)
    assert jnp.allclose(jnp.transpose(out3, (1, 2, 0)), ref1, atol=1e-3, rtol=1e-4)

    print("KERNEL_OK")
</pallas_src>

<mosaic_0001>
module attributes {stable_mosaic.version = 11 : i64} {
  func.func @_rgb2hsv_kernel(%arg0: i32, %arg1: i32, %arg2: memref<3x8x128xf32, #tpu.memory_space<vmem>>, %arg3: memref<3x8x128xf32, #tpu.memory_space<vmem>>) attributes {dimension_semantics = [#tpu.dimension_semantics<parallel>, #tpu.dimension_semantics<parallel>], iteration_bounds = array<i64: 2, 1>, scalar_prefetch = 0 : i64, scratch_operands = 0 : i64, tpu.core_type = #tpu.core_type<tc>, window_params = [{transform_indices = @transform_0, window_bounds = array<i64: 3, 8, 128>}, {transform_indices = @transform_1, window_bounds = array<i64: 3, 8, 128>}]} {
    %c0 = arith.constant 0 : index
    %c0_0 = arith.constant 0 : index
    %c0_1 = arith.constant 0 : index
    %0 = vector.load %arg2[%c0, %c0_0, %c0_1] : memref<3x8x128xf32, #tpu.memory_space<vmem>>, vector<1x8x128xf32>
    %1 = vector.shape_cast %0 : vector<1x8x128xf32> to vector<8x128xf32>
    %c1 = arith.constant 1 : index
    %c0_2 = arith.constant 0 : index
    %c0_3 = arith.constant 0 : index
    %2 = vector.load %arg2[%c1, %c0_2, %c0_3] : memref<3x8x128xf32, #tpu.memory_space<vmem>>, vector<1x8x128xf32>
    %3 = vector.shape_cast %2 : vector<1x8x128xf32> to vector<8x128xf32>
    %c2 = arith.constant 2 : index
    %c0_4 = arith.constant 0 : index
    %c0_5 = arith.constant 0 : index
    %4 = vector.load %arg2[%c2, %c0_4, %c0_5] : memref<3x8x128xf32, #tpu.memory_space<vmem>>, vector<1x8x128xf32>
    %5 = vector.shape_cast %4 : vector<1x8x128xf32> to vector<8x128xf32>
    %6 = arith.maximumf %1, %3 : vector<8x128xf32>
    %7 = arith.maximumf %6, %5 : vector<8x128xf32>
    %8 = arith.minimumf %1, %3 : vector<8x128xf32>
    %9 = arith.minimumf %8, %5 : vector<8x128xf32>
    %10 = arith.subf %7, %9 : vector<8x128xf32>
    %cst = arith.constant 0.000000e+00 : f32
    %11 = vector.broadcast %cst : f32 to vector<8x128xf32>
    %12 = arith.cmpf oeq, %10, %11 : vector<8x128xf32>
    %cst_6 = arith.constant 1.000000e+00 : f32
    %13 = vector.broadcast %cst_6 : f32 to vector<8x128xf32>
    %14 = arith.select %12, %13, %10 : vector<8x128xi1>, vector<8x128xf32>
    %cst_7 = arith.constant 0.000000e+00 : f32
    %15 = vector.broadcast %cst_7 : f32 to vector<8x128xf32>
    %16 = arith.cmpf oeq, %7, %15 : vector<8x128xf32>
    %cst_8 = arith.constant 1.000000e+00 : f32
    %17 = vector.broadcast %cst_8 : f32 to vector<8x128xf32>
    %18 = arith.select %16, %17, %7 : vector<8x128xi1>, vector<8x128xf32>
    %cst_9 = arith.constant 0.000000e+00 : f32
    %19 = vector.broadcast %cst_9 : f32 to vector<8x128xf32>
    %20 = arith.cmpf oeq, %7, %19 : vector<8x128xf32>
    %21 = tpu.reciprocal %18 {approx = true} : vector<8x128xf32> -> vector<8x128xf32>
    %22 = arith.mulf %18, %21 : vector<8x128xf32>
    %cst_10 = arith.constant 2.000000e+00 : f32
    %23 = vector.broadcast %cst_10 : f32 to vector<8x128xf32>
    %24 = arith.subf %23, %22 : vector<8x128xf32>
    %25 = arith.mulf %21, %24 : vector<8x128xf32>
    %26 = arith.mulf %10, %25 : vector<8x128xf32>
    %cst_11 = arith.constant 0.000000e+00 : f32
    %27 = vector.broadcast %cst_11 : f32 to vector<8x128xf32>
    %28 = arith.select %20, %27, %26 : vector<8x128xi1>, vector<8x128xf32>
    %29 = arith.cmpf oeq, %7, %1 : vector<8x128xf32>
    %cst_12 = arith.constant dense<true> : vector<8x128xi1>
    %30 = arith.xori %29, %cst_12 : vector<8x128xi1>
    %31 = arith.cmpf oeq, %7, %3 : vector<8x128xf32>
    %32 = arith.andi %30, %31 : vector<8x128xi1>
    %33 = arith.subf %3, %5 : vector<8x128xf32>
    %34 = arith.subf %5, %1 : vector<8x128xf32>
    %35 = arith.subf %1, %3 : vector<8x128xf32>
    %36 = arith.select %32, %34, %35 : vector<8x128xi1>, vector<8x128xf32>
    %37 = arith.select %29, %33, %36 : vector<8x128xi1>, vector<8x128xf32>
    %38 = arith.cmpf olt, %3, %5 : vector<8x128xf32>
    %cst_13 = arith.constant 3.600000e+02 : f32
    %cst_14 = arith.constant 0.000000e+00 : f32
    %39 = vector.broadcast %cst_13 : f32 to vector<8x128xf32>
    %40 = vector.broadcast %cst_14 : f32 to vector<8x128xf32>
    %41 = arith.select %38, %39, %40 : vector<8x128xi1>, vector<8x128xf32>
    %cst_15 = arith.constant 1.200000e+02 : f32
    %cst_16 = arith.constant 2.400000e+02 : f32
    %42 = vector.broadcast %cst_15 : f32 to vector<8x128xf32>
    %43 = vector.broadcast %cst_16 : f32 to vector<8x128xf32>
    %44 = arith.select %32, %42, %43 : vector<8x128xi1>, vector<8x128xf32>
    %45 = arith.select %29, %41, %44 : vector<8x128xi1>, vector<8x128xf32>
    %46 = tpu.reciprocal %14 {approx = true} : vector<8x128xf32> -> vector<8x128xf32>
    %47 = arith.mulf %14, %46 : vector<8x128xf32>
    %cst_17 = arith.constant 2.000000e+00 : f32
    %48 = vector.broadcast %cst_17 : f32 to vector<8x128xf32>
    %49 = arith.subf %48, %47 : vector<8x128xf32>
    %50 = arith.mulf %46, %49 : vector<8x128xf32>
    %51 = arith.mulf %37, %50 : vector<8x128xf32>
    %cst_18 = arith.constant 6.000000e+01 : f32
    %52 = vector.broadcast %cst_18 : f32 to vector<8x128xf32>
    %53 = arith.mulf %52, %51 : vector<8x128xf32>
    %54 = arith.addf %45, %53 : vector<8x128xf32>
    %cst_19 = arith.constant 0.000000e+00 : f32
    %55 = vector.broadcast %cst_19 : f32 to vector<8x128xf32>
    %56 = arith.cmpf oeq, %10, %55 : vector<8x128xf32>
    %cst_20 = arith.constant 0.000000e+00 : f32
    %57 = vector.broadcast %cst_20 : f32 to vector<8x128xf32>
    %58 = arith.select %56, %57, %54 : vector<8x128xi1>, vector<8x128xf32>
    %c0_21 = arith.constant 0 : index
    %c0_22 = arith.constant 0 : index
    %c0_23 = arith.constant 0 : index
    %59 = vector.load %arg3[%c0_21, %c0_22, %c0_23] : memref<3x8x128xf32, #tpu.memory_space<vmem>>, vector<1x8x128xf32>
    %60 = vector.shape_cast %59 : vector<1x8x128xf32> to vector<8x128xf32>
    %61 = vector.shape_cast %58 : vector<8x128xf32> to vector<1x8x128xf32>
    tpu.vector_store %arg3[%c0_21, %c0_22, %c0_23], %61 {strides = array<i32>} : memref<3x8x128xf32, #tpu.memory_space<vmem>>, vector<1x8x128xf32>,
    %c1_24 = arith.constant 1 : index
    %c0_25 = arith.constant 0 : index
    %c0_26 = arith.constant 0 : index
    %62 = vector.load %arg3[%c1_24, %c0_25, %c0_26] : memref<3x8x128xf32, #tpu.memory_space<vmem>>, vector<1x8x128xf32>
    %63 = vector.shape_cast %62 : vector<1x8x128xf32> to vector<8x128xf32>
    %64 = vector.shape_cast %28 : vector<8x128xf32> to vector<1x8x128xf32>
    tpu.vector_store %arg3[%c1_24, %c0_25, %c0_26], %64 {strides = array<i32>} : memref<3x8x128xf32, #tpu.memory_space<vmem>>, vector<1x8x128xf32>,
    %c2_27 = arith.constant 2 : index
    %c0_28 = arith.constant 0 : index
    %c0_29 = arith.constant 0 : index
    %65 = vector.load %arg3[%c2_27, %c0_28, %c0_29] : memref<3x8x128xf32, #tpu.memory_space<vmem>>, vector<1x8x128xf32>
    %66 = vector.shape_cast %65 : vector<1x8x128xf32> to vector<8x128xf32>
    %67 = vector.shape_cast %7 : vector<8x128xf32> to vector<1x8x128xf32>
    tpu.vector_store %arg3[%c2_27, %c0_28, %c0_29], %67 {strides = array<i32>} : memref<3x8x128xf32, #tpu.memory_space<vmem>>, vector<1x8x128xf32>,
    return
  }
  func.func @transform_0(%arg0: i32, %arg1: i32) -> (i32, i32, i32) {
    %c0_i32 = arith.constant 0 : i32
    %c0_i32_0 = arith.constant 0 : i32
    return %c0_i32, %arg0, %arg1 : i32, i32, i32
  }
  func.func @transform_1(%arg0: i32, %arg1: i32) -> (i32, i32, i32) {
    %c0_i32 = arith.constant 0 : i32
    %c0_i32_0 = arith.constant 0 : i32
    return %c0_i32, %arg0, %arg1 : i32, i32, i32
  }
}

</mosaic_0001>

<bundles_post_ra>
// kernel: tpu_custom_call.1
= control target key start
LH: loop header
LB: loop body
LE: loop exit
PB: predicated region body
PF: predicated region fallthrough
CT: control target
= control target key end

     0   :  { %6 = vsyncpa [#allocation3], 0  ;;  %s705_s0 = inlined_call_operand.hbm [shape: f32[3,16,128], index: 0, kind: input, shape index: {}]   ;;  %s706_s1 = inlined_call_operand.hbm [shape: f32[3,16,128], index: 1, kind: output, shape index: {}]  }
   0x1   :  { %8 = vsyncpa [#allocation3 + $0x1], 0 }
   0x2   :  { %9 = vsyncpa [#allocation4], 0 }
   0x3   :  { %11 = vsyncpa [#allocation4 + $0x1], 0  ;;  %s519_s6 = smov 0   ;;  %s521_s7 = smov 0  }
   0x4   :  { %s523_s8 = smov 0   ;;  %s525_s9 = smov 0  }
   0x5   :  { %s527_s10 = smov 0   ;;  %s529_s11 = smov 0  }
   0x6 LB: > { %s294_s12 = sadd.s32 4294967295, %s496_s11   ;;  %s295_s13 = sadd.s32 4294967294, %s496_s11   ;;  %s496_s11 = sphi %s529_s11, %s17_s11   ;;  %s492_s10 = sphi %s527_s10, %s720_s10   ;;  %s488_s9 = sphi %s525_s9, %s719_s9   ;;  %s484_s8 = sphi %s523_s8, %s718_s8   ;;  %s480_s7 = sphi %s521_s7, %s717_s7   ;;  %s476_s6 = sphi %s519_s6, %s716_s6  }
   0x7   : > { %s29_s14 = sadd.s32 1, %s492_s10  ;;  %s38_s15 = sadd.s32 1, %s484_s8 }
   0x8   : > { %p31_p0 = scmp.ge.s32.totalorder %s29_s14, 2  ;;  %p45_p1 = scmp.ne.s32.totalorder %s484_s8, %s480_s7 }
   0x9   : > { %p46_p2 = scmp.eq.s32.totalorder %s496_s11, 0  ;;  %p51_p3 = scmp.ne.s32.totalorder %s480_s7, %s476_s6 }
   0xa   : > { %s722_s14 = smov (%p31_p0, %s29_s14), 0  ;;  %p52_p5 = scmp.eq.s32.totalorder %s294_s12, 0 }
   0xb   : > { %p560_p4 = por %p46_p2, %p45_p1  ;;  %s33_s17 = ssub.s32 %s492_s10, %s722_s14 }
   0xc   : > { %p77_p6 = scmp.eq.s32.totalorder %s294_s12, 1  ;;  %p36_p7 = scmp.eq.s32.totalorder %s33_s17, 0 }
   0xd   : > { %p566_p8 = por %p52_p5, %p51_p3  ;;  %p83_p10 = scmp.eq.s32.totalorder %s295_s13, 1 }
   0xe   : > { %p570_p9 = por %p77_p6, %p45_p1  ;;  %p321_p13 = scmp.lt.s32.totalorder %s496_s11, 2 }
   0xf   : > { %s575_s20 = scalar_select %p36_p7, %s484_s8, %s38_s15  }
  0x10   : > { %s710_s19 = scalar_select %p570_p9, 1, 0 }
  0x11   : > { %p577_p11 = por %p83_p10, %p51_p3  ;;  %s103_s22 = sand.u32 1, %s484_s8  }
  0x12   : > { %s307_s23 = smul.u32 24, %s103_s22  ;;  %s298_s24 = sshll.u32 %s492_s10, 7 }
  0x13   : > { %s711_s21 = scalar_select %p577_p11, 1, 0 }
  0x14   : > { %p587_p0 = pnand %p321_p13, %p560_p4  ;;  %s594_s28 = scalar_lea.hbm %s705_s0, %s298_s24 }
  0x15   : > { %s107_s29 = scalar_lea.vmem [#allocation2], %s307_s23  ;;  %s598_s2 = scalar_lea.sflag [#allocation3], %s103_s22 }
  0x16   : > { %s114_s30 = sshll.u32 %s107_s29, 4  ;;  %s384_s3 = scalar_lea.hbm %s594_s28, 384  ;;  %s596_s30 = int_to_ptr.vmem [resolvable:$true] %s114_s30 }
  0x17   : > { %p385_p1 = scmp.ne.s32.totalorder %s594_s28, %s384_s3  ;;  %p386_p2 = pneg %p587_p0 }
  0x18   : > { %s389_s12 = scalar_lea.hbm %s705_s0, 768  ;;  %p390_p5 = scmp.lt.u32.totalorder %s594_s28, %s705_s0 }
  0x19   : > { %p387_p3 = pnand %p386_p2, %p385_p1  ;;  %p391_p6 = scmp.lt.u32.totalorder %s389_s12, %s384_s3 }
  0x1a   : > { %p393_p10 = scmp.lt.u32.totalorder %s384_s3, %s594_s28 }
  0x1b   : > { %p388_p4 = pneg %p387_p3  ;;  %p392_p7 = por %p391_p6, %p390_p5 }
  0x1d   : > { %p394_p13 = por %p393_p10, %p392_p7 }
  0x1f   : > { %p395_p12 = pnand %p394_p13, %p388_p4 }
  0x21   : > { %398 = shalt.err (!%p395_p12)
}
  0x22   : > { %s399_s16 = scalar_lea.vmem %s596_s30, 384  ;;  %s498_s17 = smov [#allocation2]  }
  0x23   : > { %p400_p1 = scmp.ne.s32.totalorder %s596_s30, %s399_s16  ;;  %s404_s22 = sshll.u32 %s498_s17, 4  ;;  %s405_s22 = int_to_ptr.vmem [resolvable:$false] %s404_s22 }
  0x24   : > { %s406_s23 = scalar_lea.vmem %s405_s22, 768  ;;  %p407_p9 = scmp.lt.s32.totalorder %s596_s30, %s405_s22 }
  0x25   : > { %p402_p3 = pnand %p400_p1, %p386_p2  ;;  %p408_p5 = scmp.lt.s32.totalorder %s406_s23, %s399_s16 }
  0x27   : > { %p403_p11 = pneg %p402_p3  ;;  %p409_p6 = por %p408_p5, %p407_p9 }
  0x29   : > { %p410_p7 = pnand %p409_p6, %p403_p11 }
  0x2b   : > { %413 = shalt.err (!%p410_p7)
}
  0x2c   : > { %s499_s24 = smov 256   ;;  %s500_s26 = smov 128  }
  0x2d   : > { %s501_s27 = smov 8   ;;  %p299_p12 = scmp.ge.s32.totalorder %s496_s11, 1 }
  0x2e   : > { %316 = dma.hbm_to_vmem [thread:$0]  (!%p587_p0), %s594_s28, 384, %s596_s30, %s598_s2, %s499_s24, %s500_s26, %s501_s27  }
  0x2f   : > { %p122_p2 = scmp.lt.s32.totalorder %s496_s11, 3 }
  0x31   : > { %p123_p4 = pnand %p299_p12, %p122_p2 }
  0x32   : > { %s629_s29 = sand.u32 (!%p123_p4), 1, %s480_s7  }
  0x33   : > { %126 = sbr.rel (%p123_p4) target bundleno = 108 (0x6c), region = 24  ;;  %s129_s4 = scalar_lea.sflag (!%p123_p4), [#allocation3], %s629_s29 }
  0x34   : > { %s308_s3 = smul.u32 (!%p123_p4), 24, %s629_s29 }
  0x36   : > { %s132_s5 = scalar_lea.vmem (!%p123_p4), [#allocation2], %s308_s3 }
  0x3a   : > { %467 = dma.done.wait (%p566_p8), %s129_s4, 384  }
  0x3b   : > { %469 = vsyncadd (%p566_p8), %s129_s4, 4294966912  ;;  %v151_v0 = vld [vmem:[%s132_s5] sm:$0xff]  ;;  %v300_v1 = vld [vmem:[%s132_s5 + $0x8] sm:$0xff]  ;;  %s637_s25 = scalar_lea.vmem [#allocation5], %s308_s3  ;;  %vm502_vm3 = vmmov 1   ;;  %v503_v22 = vmov 0.0  }
  0x3c   : > { %v301_v2 = vld [vmem:[%s132_s5 + $0x10] sm:$0xff]  ;;  %v156_v3 = vmax.f32 %v151_v0, %v300_v1  ;;  %v158_v4 = vmin.f32 %v151_v0, %v300_v1  ;;  %v177_v11 = vsub.f32 %v151_v0, %v300_v1  ;;  %v504_v24 = vmov 240.0   ;;  %s211_s18 = sshll.u32 %s637_s25, 4  ;;  %s304_s28 = sshll.u32 %s488_s9, 7  ;;  %s649_s18 = int_to_ptr.vmem [resolvable:$true] %s211_s18 }
  0x3d   : > { %v176_v10 = vsub.f32 %v301_v2, %v151_v0  ;;  %v175_v15 = vsub.f32 %v300_v1, %v301_v2  ;;  %vm180_vm7 = vcmp.lt.f32.partialorder %v300_v1, %v301_v2  ;;  %s654_s12 = scalar_lea.hbm %s706_s1, %s304_s28  ;;  %s198_s13 = scalar_lea.sflag [#allocation4], %s629_s29 }
  0x3e   : > { %v157_v5 = vmax.f32 %v156_v3, %v301_v2  ;;  %v159_v6 = vmin.f32 %v158_v4, %v301_v2  ;;  %v181_v23 = vsel %vm180_vm7, 360.0, %v503_v22  ;;  %s414_s15 = scalar_lea.vmem %s649_s18, 384  ;;  %p713_p9 = scmp.ne.s32.totalorder %s710_s19, 0 }
  0x3f   : > { %p415_p8 = scmp.ne.s32.totalorder %s649_s18, %s414_s15  ;;  %s505_s9 = smov [#allocation5]  }
  0x40   : > { %v160_v7 = vsub.f32 %v157_v5, %v159_v6  ;;  %303 = vst [vmem:[%s637_s25 + $0x10] sm:$0xff] %v157_v5  ;;  %vm163_vm0 = vcmp.eq.f32.partialorder %v157_v5, 0.0  ;;  %vm171_vm2 = vcmp.eq.f32.partialorder %v157_v5, %v151_v0  ;;  %vm173_vm5 = vcmp.eq.f32.partialorder %v157_v5, %v300_v1  ;;  %s418_s16 = sshll.u32 %s505_s9, 4  ;;  %s419_s16 = int_to_ptr.vmem [resolvable:$false] %s418_s16 }
  0x41   : > { %v164_v8 = vsel %vm163_vm0, 1.0, %v157_v5  ;;  %vm172_vm4 = vmxor %vm171_vm2, %vm502_vm3  ;;  %p416_p11 = pnand %p415_p8, %p713_p9  ;;  %s420_s17 = scalar_lea.vmem %s419_s16, 768 }
  0x42   : > { %vm161_vm1 = vcmp.eq.f32.partialorder %v160_v7, 0.0  ;;  %380 = vrcp.f32 %v164_v8  ;;  %vm174_vm6 = vmand %vm172_vm4, %vm173_vm5  ;;  %p421_p10 = scmp.lt.s32.totalorder %s649_s18, %s419_s16  ;;  %p422_p13 = scmp.lt.s32.totalorder %s420_s17, %s414_s15 }
  0x43   : > { %v162_v9 = vsel %vm161_vm1, 1.0, %v160_v7  ;;  %v178_v16 = vsel %vm174_vm6, %v176_v10, %v177_v11  ;;  %v182_v25 = vsel %vm174_vm6, 120.0, %v504_v24  ;;  %p417_p0 = pneg %p416_p11 }
  0x44   : > { %382 = vrcp.f32 %v162_v9  ;;  %v179_v21 = vsel %vm171_vm2, %v175_v15, %v178_v16  ;;  %v183_v30 = vsel %vm171_vm2, %v181_v23, %v182_v25  ;;  %p423_p1 = por %p422_p13, %p421_p10 }
  0x46   : > { %p424_p3 = pnand %p423_p1, %p417_p0 }
  0x4c   : > { %v381_v12 = vpop.eup %380 }
  0x4d   : > { %v166_v13 = vmul.f32 %v381_v12, %v164_v8 }
  0x4e   : > { %v383_v14 = vpop.eup %382 }
  0x4f   : > { %v185_v17 = vmul.f32 %v383_v14, %v162_v9  ;;  %v167_v18 = vsub.f32 2.0, %v166_v13 }
  0x51   : > { %v186_v19 = vsub.f32 2.0, %v185_v17  ;;  %v168_v20 = vmul.f32 %v381_v12, %v167_v18 }
  0x53   : > { %v187_v26 = vmul.f32 %v383_v14, %v186_v19  ;;  %v169_v27 = vmul.f32 %v168_v20, %v160_v7 }
  0x55   : > { %v188_v28 = vmul.f32 %v187_v26, %v179_v21  ;;  %v170_v29 = vsel %vm163_vm0, 0.0, %v169_v27 }
  0x56   : > { %302 = vst [vmem:[%s637_s25 + $0x8] sm:$0xff] %v170_v29 }
  0x57   : > { %v189_v31 = vmul.f32 60.0, %v188_v28 }
  0x59   : > { %v190_v32 = vadd.f32 %v189_v31, %v183_v30 }
  0x5b   : > { %v191_v33 = vsel %vm161_vm1, 0.0, %v190_v32 }
  0x5c   : > { %192 = vst [vmem:[%s637_s25] sm:$0xff] %v191_v33 }
  0x5d   : > { %427 = shalt.err (!%p424_p3)
}
  0x5e   : > { %s428_s22 = scalar_lea.hbm %s654_s12, 384  ;;  %s432_s26 = scalar_lea.hbm %s706_s1, 768 }
  0x5f   : > { %p429_p5 = scmp.ne.s32.totalorder %s654_s12, %s428_s22  ;;  %p433_p12 = scmp.lt.u32.totalorder %s654_s12, %s706_s1 }
  0x60   : > { %p434_p2 = scmp.lt.u32.totalorder %s432_s26, %s428_s22  ;;  %p436_p8 = scmp.lt.u32.totalorder %s428_s22, %s654_s12 }
  0x61   : > { %p430_p6 = pnand %p429_p5, %p713_p9 }
  0x62   : > { %p435_p4 = por %p434_p2, %p433_p12 }
  0x63   : > { %p431_p7 = pneg %p430_p6 }
  0x64   : > { %p437_p11 = por %p436_p8, %p435_p4 }
  0x66   : > { %p438_p0 = pnand %p437_p11, %p431_p7 }
  0x68   : > { %441 = shalt.err (!%p438_p0)
}
  0x69   : > { %s506_s4 = smov 128   ;;  %s507_s5 = smov 256  }
  0x6a   : > { %s508_s25 = smov 8  }
  0x6b   : > { %311 = dma.vmem_to_hbm [thread:$0]  (%p713_p9), %s649_s18, 384, %s654_s12, %s198_s13, %s506_s4, %s507_s5, %s508_s25  }
  0x6c PF: > { %s226_s28 = sand.u32 1, %s476_s6   ;;  %p714_p10 = scmp.ne.s32.totalorder %s711_s21, 0 }
  0x6d   : > { %p715_p13 = scmp.ge.s32.totalorder %s496_s11, 2  ;;  %s227_s30 = scalar_lea.sflag [#allocation4], %s226_s28 }
  0x6f   : > { %p318_p1 = pnand %p715_p13, %p714_p10 }
  0x71   : > { %471 = dma.done.wait (!%p318_p1), %s227_s30, 384  }
  0x72   : > { %473 = vsyncadd (!%p318_p1), %s227_s30, 4294966912  ;;  %s17_s11 = sadd.s32 1, %s496_s11   ;;  %s716_s6 = smov %s480_s7 }
  0x73   : > { %p14_p3 = scmp.ge.s32.totalorder %s17_s11, 4   ;;  %s717_s7 = smov %s484_s8 }
  0x74   : > { %s718_s8 = smov %s575_s20  ;;  %s719_s9 = smov %s492_s10 }
  0x75   : > { %s720_s10 = smov %s722_s14  ;;  %16 = sbr.rel (!%p14_p3) target bundleno = 6 (0x6), region = 73 }
  0x7c   :  { %232 = vsyncpa [#allocation3], 1 }
  0x7d   :  { %234 = vsyncpa [#allocation3 + $0x1], 1 }
  0x7e   :  { %235 = vsyncpa [#allocation4], 1 }
  0x7f   :  { %237 = vsyncpa [#allocation4 + $0x1], 1 }

</bundles_post_ra>
